<compile_context>
chip_gen: v5e
topology: v5e:2x2
jax: 0.10.0
libtpu: 0.0.40
codegen_flags: <defaults>
</compile_context>

<pallas_src>
import jax
import jax.numpy as jnp
from jax.experimental import pallas as pl
from jax.experimental.pallas import tpu as pltpu


def _minmax_softmax(e):
    """(e - min) / (max - min + 1e-8) followed by softmax over the last axis.

    After min-max normalization every row lies in [0, 1], so the usual
    "subtract row max before exp" stabilization is unnecessary (it cancels
    exactly) -- dropping it saves one XLU row-reduce + one VPU subtract.
    """
    mx = jnp.max(e, axis=-1, keepdims=True)
    mn = jnp.min(e, axis=-1, keepdims=True)
    e = (e - mn) / (mx - mn + 1e-8)
    p = jnp.exp(e)
    return p * pl.reciprocal(jnp.sum(p, axis=-1, keepdims=True), approx=False)


def attention_kernel(sc_ref, x_ref, out_ref):
    # sc_ref : SMEM (10,) f32 scalars
    #          [g_c, g_t, A_c, B_c, C_c, D_c, A_t, B_t, C_t, D_t]
    # x_ref  : VMEM (TB, H, W)   one block of batch elements (C == 1 squeezed)
    # out_ref: VMEM (TB, 3, H, W) = concat(x, channel_attn_out, time_attn_out)
    x = x_ref[...]                                  # (TB, H, W) f32
    g_c = sc_ref[0]
    g_t = sc_ref[1]
    a_c, b_c, c_c, d_c = sc_ref[2], sc_ref[3], sc_ref[4], sc_ref[5]
    a_t, b_t, c_t, d_t = sc_ref[6], sc_ref[7], sc_ref[8], sc_ref[9]

    # ---------------- Channel_Module ----------------
    # energy[b,w,v] = sum_{o,h} (w1[o] x[h,w] + b1[o]) (w2[o] x[h,v] + b2[o])
    #              = A_c * (x^T x)[w,v] + B_c*cs[w] + C_c*cs[v] + D_c
    gram_c = jnp.einsum('bhw,bhv->bwv', x, x,
                        preferred_element_type=jnp.float32)     # (TB, W, W)
    csum = jnp.sum(x, axis=1)                                   # (TB, W)
    energy_c = (a_c * gram_c
                + b_c * csum[:, :, None]
                + c_c * csum[:, None, :]
                + d_c)
    att_c = _minmax_softmax(energy_c)                           # (TB, W, W)
    # out_c = x @ attention^T
    out_c = jnp.einsum('bhv,bwv->bhw', x, att_c,
                       preferred_element_type=jnp.float32)      # (TB, H, W)
    out1 = g_c * out_c + x

    # ---------------- Time_Module ----------------
    # energy[b,h,g] = A_t * (x x^T)[h,g] + B_t*rs[h] + C_t*rs[g] + D_t
    gram_t = jnp.einsum('bhw,bgw->bhg', x, x,
                        preferred_element_type=jnp.float32)     # (TB, H, H)
    rsum = jnp.sum(x, axis=2)                                   # (TB, H)
    energy_t = (a_t * gram_t
                + b_t * rsum[:, :, None]
                + c_t * rsum[:, None, :]
                + d_t)
    att_t = _minmax_softmax(energy_t)                           # (TB, H, H)
    out_t = jnp.einsum('bhg,bgw->bhw', att_t, x,
                       preferred_element_type=jnp.float32)      # (TB, H, W)
    out2 = g_t * out_t + x

    # concat((x, out1, out2), dim=1)
    out_ref[:, 0, :, :] = x.astype(out_ref.dtype)
    out_ref[:, 1, :, :] = out1.astype(out_ref.dtype)
    out_ref[:, 2, :, :] = out2.astype(out_ref.dtype)


def attention_forward(x_nchw, params, *, tb_max=128):
    B, C, H, W = x_nchw.shape
    assert C == 1, "module reshape semantics require in_dim == 1"
    (w1c, b1c, w2c, b2c, w1t, b1t, w2t, b2t, gamma_c, gamma_t) = params

    # Collapse the 1x1-conv weights/biases of each module into the 4 scalars
    # of the rank-1 energy decomposition (parameter glue, plain JAX).
    scalars = jnp.stack([
        jnp.asarray(gamma_c, jnp.float32),
        jnp.asarray(gamma_t, jnp.float32),
        jnp.sum(w1c * w2c), jnp.sum(w1c * b2c),
        jnp.sum(b1c * w2c), H * jnp.sum(b1c * b2c),
        jnp.sum(w1t * w2t), jnp.sum(w1t * b2t),
        jnp.sum(b1t * w2t), W * jnp.sum(b1t * b2t),
    ]).astype(jnp.float32)                                      # (10,)

    x_bhw = x_nchw[:, 0, :, :]                                  # (B, H, W)

    # Batch blocking: TB examples per grid step (pad B up if needed).
    TB = min(B, tb_max)
    n_blocks = pl.cdiv(B, TB)
    B_pad = n_blocks * TB
    if B_pad != B:
        x_bhw = jnp.pad(x_bhw, ((0, B_pad - B), (0, 0), (0, 0)))

    out = pl.pallas_call(
        attention_kernel,
        out_shape=jax.ShapeDtypeStruct((B_pad, 3 * C, H, W), jnp.float32),
        grid_spec=pltpu.PrefetchScalarGridSpec(
            num_scalar_prefetch=1,                 # scalars land in SMEM
            grid=(n_blocks,),
            in_specs=[
                pl.BlockSpec((TB, H, W), lambda b, sc: (b, 0, 0)),
            ],
            out_specs=pl.BlockSpec((TB, 3 * C, H, W),
                                   lambda b, sc: (b, 0, 0, 0)),
        ),
        compiler_params=pltpu.CompilerParams(
            dimension_semantics=("parallel",)),     # shard batch across TCs
    )(scalars, x_bhw)

    if B_pad != B:
        out = out[:B]
    return out


# ----------------- pure-JAX reference (mirrors the PyTorch forward) ----------
def ref_forward(x, w1c, b1c, w2c, b2c, w1t, b1t, w2t, b2t, g_c, g_t):
    B, C, H, W = x.shape

    def conv1x1(x, w, b):                        # in_channels == 1
        return x * w[None, :, None, None] + b[None, :, None, None]  # (B,8,H,W)

    # Channel module
    qv = conv1x1(x, w1c, b1c).transpose(0, 3, 1, 2).reshape(B, W, 8 * H)
    ky = conv1x1(x, w2c, b2c).reshape(B, 8 * H, W)
    e = jnp.matmul(qv, ky)
    mx = e.max(axis=2, keepdims=True); mn = e.min(axis=2, keepdims=True)
    att = jax.nn.softmax((e - mn) / (mx - mn + 1e-8), axis=2)
    att = att.reshape(B, 1, W, W)
    out1 = g_c * jnp.matmul(x, att.transpose(0, 1, 3, 2)) + x

    # Time module
    pq = conv1x1(x, w1t, b1t).transpose(0, 2, 1, 3).reshape(B, H, 8 * W)
    pk = conv1x1(x, w2t, b2t).transpose(0, 1, 3, 2).reshape(B, 8 * W, H)
    e = jnp.matmul(pq, pk)
    mx = e.max(axis=2, keepdims=True); mn = e.min(axis=2, keepdims=True)
    att = jax.nn.softmax((e - mn) / (mx - mn + 1e-8), axis=2)
    att = att.reshape(B, 1, H, H)
    out2 = g_t * jnp.matmul(att, x) + x

    return jnp.concatenate([x, out1, out2], axis=1)


if __name__ == "__main__":
    key = jax.random.PRNGKey(0)
    B, C, H, W = 2, 1, 16, 16        # in_dim = 1 (required by the module's reshapes)
    keys = jax.random.split(key, 9)
    x = jax.random.normal(keys[0], (B, C, H, W), dtype=jnp.float32)

    scale = 0.1
    w1c = scale * jax.random.normal(keys[1], (8,), jnp.float32)
    b1c = scale * jax.random.normal(keys[2], (8,), jnp.float32)
    w2c = scale * jax.random.normal(keys[3], (8,), jnp.float32)
    b2c = scale * jax.random.normal(keys[4], (8,), jnp.float32)
    w1t = scale * jax.random.normal(keys[5], (8,), jnp.float32)
    b1t = scale * jax.random.normal(keys[6], (8,), jnp.float32)
    w2t = scale * jax.random.normal(keys[7], (8,), jnp.float32)
    b2t = scale * jax.random.normal(keys[8], (8,), jnp.float32)
    # The PyTorch module initializes gamma to 0 (attention branch would be a
    # no-op); use a deterministic nonzero value so the kernel path is exercised.
    gamma_c, gamma_t = 0.5, 0.5

    params = (w1c, b1c, w2c, b2c, w1t, b1t, w2t, b2t, gamma_c, gamma_t)
    out = attention_forward(x, params)
    out = jax.block_until_ready(out)

    ref = ref_forward(x, w1c, b1c, w2c, b2c, w1t, b1t, w2t, b2t,
                      jnp.float32(gamma_c), jnp.float32(gamma_t))
    assert out.shape == (B, 3 * C, H, W)
    assert jnp.allclose(out, ref, rtol=1e-4, atol=1e-4), \
        float(jnp.max(jnp.abs(out - ref)))
    print("KERNEL_OK")
</pallas_src>

<mosaic_0001>
module attributes {stable_mosaic.version = 11 : i64} {
  func.func @attention_kernel(%arg0: i32, %arg1: memref<10xf32, #tpu.memory_space<smem>>, %arg2: memref<2x16x16xf32, #tpu.memory_space<vmem>>, %arg3: memref<2x3x16x16xf32, #tpu.memory_space<vmem>>) attributes {dimension_semantics = [#tpu.dimension_semantics<parallel>], iteration_bounds = array<i64: 1>, scalar_prefetch = 1 : i64, scratch_operands = 0 : i64, tpu.core_type = #tpu.core_type<tc>, window_params = [{transform_indices = @transform_0, window_bounds = array<i64: 2, 16, 16>}, {transform_indices = @transform_1, window_bounds = array<i64: 2, 3, 16, 16>}]} {
    %c0 = arith.constant 0 : index
    %c0_0 = arith.constant 0 : index
    %c0_1 = arith.constant 0 : index
    %0 = vector.load %arg2[%c0, %c0_0, %c0_1] : memref<2x16x16xf32, #tpu.memory_space<vmem>>, vector<2x16x16xf32>
    %c0_2 = arith.constant 0 : index
    %1 = memref.load %arg1[%c0_2] : memref<10xf32, #tpu.memory_space<smem>>
    %c1 = arith.constant 1 : index
    %2 = memref.load %arg1[%c1] : memref<10xf32, #tpu.memory_space<smem>>
    %c2 = arith.constant 2 : index
    %3 = memref.load %arg1[%c2] : memref<10xf32, #tpu.memory_space<smem>>
    %c3 = arith.constant 3 : index
    %4 = memref.load %arg1[%c3] : memref<10xf32, #tpu.memory_space<smem>>
    %c4 = arith.constant 4 : index
    %5 = memref.load %arg1[%c4] : memref<10xf32, #tpu.memory_space<smem>>
    %c5 = arith.constant 5 : index
    %6 = memref.load %arg1[%c5] : memref<10xf32, #tpu.memory_space<smem>>
    %c6 = arith.constant 6 : index
    %7 = memref.load %arg1[%c6] : memref<10xf32, #tpu.memory_space<smem>>
    %c7 = arith.constant 7 : index
    %8 = memref.load %arg1[%c7] : memref<10xf32, #tpu.memory_space<smem>>
    %c8 = arith.constant 8 : index
    %9 = memref.load %arg1[%c8] : memref<10xf32, #tpu.memory_space<smem>>
    %c9 = arith.constant 9 : index
    %10 = memref.load %arg1[%c9] : memref<10xf32, #tpu.memory_space<smem>>
    "tpu.trace_start"() <{level = 10 : i32, message = "bhw,bhv->bwv"}> : () -> ()
    %cst = arith.constant dense<0.000000e+00> : vector<2x16x16xf32>
    %11 = tpu.matmul %0, %0, %cst {dimension_numbers = #tpu.dot_dimension_numbers<[1], [1], [2], [2], [0, 0, 0, 2, 1, 2], [0], [0]>} : vector<2x16x16xf32>, vector<2x16x16xf32>, vector<2x16x16xf32> -> vector<2x16x16xf32>
    "tpu.trace_stop"() : () -> ()
    %cst_3 = arith.constant dense<0.000000e+00> : vector<2x16xf32>
    %12 = vector.multi_reduction <add>, %0, %cst_3 [1] : vector<2x16x16xf32> to vector<2x16xf32>
    %13 = vector.broadcast %3 : f32 to vector<2x16x16xf32>
    %14 = arith.mulf %13, %11 : vector<2x16x16xf32>
    %15 = vector.shape_cast %12 : vector<2x16xf32> to vector<2x16x1xf32>
    %16 = vector.broadcast %4 : f32 to vector<2x16x1xf32>
    %17 = arith.mulf %16, %15 : vector<2x16x1xf32>
    %18 = vector.broadcast %17 : vector<2x16x1xf32> to vector<2x16x16xf32>
    %19 = arith.addf %14, %18 : vector<2x16x16xf32>
    %20 = vector.shape_cast %12 : vector<2x16xf32> to vector<2x1x16xf32>
    %21 = vector.broadcast %5 : f32 to vector<2x1x16xf32>
    %22 = arith.mulf %21, %20 : vector<2x1x16xf32>
    %23 = vector.broadcast %22 : vector<2x1x16xf32> to vector<2x16x16xf32>
    %24 = arith.addf %19, %23 : vector<2x16x16xf32>
    %25 = vector.broadcast %6 : f32 to vector<2x16x16xf32>
    %26 = arith.addf %24, %25 : vector<2x16x16xf32>
    %cst_4 = arith.constant dense<0xFF800000> : vector<2x16xf32>
    %27 = vector.multi_reduction <maximumf>, %26, %cst_4 [2] : vector<2x16x16xf32> to vector<2x16xf32>
    %28 = vector.shape_cast %27 : vector<2x16xf32> to vector<2x16x1xf32>
    %cst_5 = arith.constant dense<0x7F800000> : vector<2x16xf32>
    %29 = vector.multi_reduction <minimumf>, %26, %cst_5 [2] : vector<2x16x16xf32> to vector<2x16xf32>
    %30 = vector.shape_cast %29 : vector<2x16xf32> to vector<2x16x1xf32>
    %31 = vector.broadcast %30 : vector<2x16x1xf32> to vector<2x16x16xf32>
    %32 = arith.subf %26, %31 : vector<2x16x16xf32>
    %33 = arith.subf %28, %30 : vector<2x16x1xf32>
    %cst_6 = arith.constant 9.99999993E-9 : f32
    %34 = vector.broadcast %cst_6 : f32 to vector<2x16x1xf32>
    %35 = arith.addf %33, %34 : vector<2x16x1xf32>
    %36 = vector.broadcast %35 : vector<2x16x1xf32> to vector<2x16x16xf32>
    %37 = arith.divf %32, %36 : vector<2x16x16xf32>
    %38 = math.exp %37 : vector<2x16x16xf32>
    %cst_7 = arith.constant dense<0.000000e+00> : vector<2x16xf32>
    %39 = vector.multi_reduction <add>, %38, %cst_7 [2] : vector<2x16x16xf32> to vector<2x16xf32>
    %40 = vector.shape_cast %39 : vector<2x16xf32> to vector<2x16x1xf32>
    %41 = tpu.reciprocal %40 : vector<2x16x1xf32> -> vector<2x16x1xf32>
    %42 = vector.broadcast %41 : vector<2x16x1xf32> to vector<2x16x16xf32>
    %43 = arith.mulf %38, %42 : vector<2x16x16xf32>
    "tpu.trace_start"() <{level = 10 : i32, message = "bhv,bwv->bhw"}> : () -> ()
    %cst_8 = arith.constant dense<0.000000e+00> : vector<2x16x16xf32>
    %44 = tpu.matmul %0, %43, %cst_8 {dimension_numbers = #tpu.dot_dimension_numbers<[2], [2], [1], [1], [0, 0, 0, 1, 1, 1], [0], [0]>} : vector<2x16x16xf32>, vector<2x16x16xf32>, vector<2x16x16xf32> -> vector<2x16x16xf32>
    "tpu.trace_stop"() : () -> ()
    %45 = vector.broadcast %1 : f32 to vector<2x16x16xf32>
    %46 = arith.mulf %45, %44 : vector<2x16x16xf32>
    %47 = arith.addf %46, %0 : vector<2x16x16xf32>
    "tpu.trace_start"() <{level = 10 : i32, message = "bhw,bgw->bhg"}> : () -> ()
    %cst_9 = arith.constant dense<0.000000e+00> : vector<2x16x16xf32>
    %48 = tpu.matmul %0, %0, %cst_9 {dimension_numbers = #tpu.dot_dimension_numbers<[2], [2], [1], [1], [0, 0, 0, 1, 1, 1], [0], [0]>} : vector<2x16x16xf32>, vector<2x16x16xf32>, vector<2x16x16xf32> -> vector<2x16x16xf32>
    "tpu.trace_stop"() : () -> ()
    %cst_10 = arith.constant dense<0.000000e+00> : vector<2x16xf32>
    %49 = vector.multi_reduction <add>, %0, %cst_10 [2] : vector<2x16x16xf32> to vector<2x16xf32>
    %50 = vector.broadcast %7 : f32 to vector<2x16x16xf32>
    %51 = arith.mulf %50, %48 : vector<2x16x16xf32>
    %52 = vector.shape_cast %49 : vector<2x16xf32> to vector<2x16x1xf32>
    %53 = vector.broadcast %8 : f32 to vector<2x16x1xf32>
    %54 = arith.mulf %53, %52 : vector<2x16x1xf32>
    %55 = vector.broadcast %54 : vector<2x16x1xf32> to vector<2x16x16xf32>
    %56 = arith.addf %51, %55 : vector<2x16x16xf32>
    %57 = vector.shape_cast %49 : vector<2x16xf32> to vector<2x1x16xf32>
    %58 = vector.broadcast %9 : f32 to vector<2x1x16xf32>
    %59 = arith.mulf %58, %57 : vector<2x1x16xf32>
    %60 = vector.broadcast %59 : vector<2x1x16xf32> to vector<2x16x16xf32>
    %61 = arith.addf %56, %60 : vector<2x16x16xf32>
    %62 = vector.broadcast %10 : f32 to vector<2x16x16xf32>
    %63 = arith.addf %61, %62 : vector<2x16x16xf32>
    %cst_11 = arith.constant dense<0xFF800000> : vector<2x16xf32>
    %64 = vector.multi_reduction <maximumf>, %63, %cst_11 [2] : vector<2x16x16xf32> to vector<2x16xf32>
    %65 = vector.shape_cast %64 : vector<2x16xf32> to vector<2x16x1xf32>
    %cst_12 = arith.constant dense<0x7F800000> : vector<2x16xf32>
    %66 = vector.multi_reduction <minimumf>, %63, %cst_12 [2] : vector<2x16x16xf32> to vector<2x16xf32>
    %67 = vector.shape_cast %66 : vector<2x16xf32> to vector<2x16x1xf32>
    %68 = vector.broadcast %67 : vector<2x16x1xf32> to vector<2x16x16xf32>
    %69 = arith.subf %63, %68 : vector<2x16x16xf32>
    %70 = arith.subf %65, %67 : vector<2x16x1xf32>
    %cst_13 = arith.constant 9.99999993E-9 : f32
    %71 = vector.broadcast %cst_13 : f32 to vector<2x16x1xf32>
    %72 = arith.addf %70, %71 : vector<2x16x1xf32>
    %73 = vector.broadcast %72 : vector<2x16x1xf32> to vector<2x16x16xf32>
    %74 = arith.divf %69, %73 : vector<2x16x16xf32>
    %75 = math.exp %74 : vector<2x16x16xf32>
    %cst_14 = arith.constant dense<0.000000e+00> : vector<2x16xf32>
    %76 = vector.multi_reduction <add>, %75, %cst_14 [2] : vector<2x16x16xf32> to vector<2x16xf32>
    %77 = vector.shape_cast %76 : vector<2x16xf32> to vector<2x16x1xf32>
    %78 = tpu.reciprocal %77 : vector<2x16x1xf32> -> vector<2x16x1xf32>
    %79 = vector.broadcast %78 : vector<2x16x1xf32> to vector<2x16x16xf32>
    %80 = arith.mulf %75, %79 : vector<2x16x16xf32>
    "tpu.trace_start"() <{level = 10 : i32, message = "bhg,bgw->bhw"}> : () -> ()
    %cst_15 = arith.constant dense<0.000000e+00> : vector<2x16x16xf32>
    %81 = tpu.matmul %80, %0, %cst_15 {dimension_numbers = #tpu.dot_dimension_numbers<[2], [1], [1], [2], [0, 0, 0, 1, 1, 2], [0], [0]>} : vector<2x16x16xf32>, vector<2x16x16xf32>, vector<2x16x16xf32> -> vector<2x16x16xf32>
    "tpu.trace_stop"() : () -> ()
    %82 = vector.broadcast %2 : f32 to vector<2x16x16xf32>
    %83 = arith.mulf %82, %81 : vector<2x16x16xf32>
    %84 = arith.addf %83, %0 : vector<2x16x16xf32>
    %c0_16 = arith.constant 0 : index
    %c0_17 = arith.constant 0 : index
    %c0_18 = arith.constant 0 : index
    %c0_19 = arith.constant 0 : index
    %85 = vector.load %arg3[%c0_16, %c0_17, %c0_18, %c0_19] : memref<2x3x16x16xf32, #tpu.memory_space<vmem>>, vector<2x1x16x16xf32>
    %86 = vector.shape_cast %85 : vector<2x1x16x16xf32> to vector<2x16x16xf32>
    %87 = vector.shape_cast %0 : vector<2x16x16xf32> to vector<2x1x16x16xf32>
    tpu.vector_store %arg3[%c0_16, %c0_17, %c0_18, %c0_19], %87 {strides = array<i32>} : memref<2x3x16x16xf32, #tpu.memory_space<vmem>>, vector<2x1x16x16xf32>,
    %c0_20 = arith.constant 0 : index
    %c1_21 = arith.constant 1 : index
    %c0_22 = arith.constant 0 : index
    %c0_23 = arith.constant 0 : index
    %88 = vector.load %arg3[%c0_20, %c1_21, %c0_22, %c0_23] : memref<2x3x16x16xf32, #tpu.memory_space<vmem>>, vector<2x1x16x16xf32>
    %89 = vector.shape_cast %88 : vector<2x1x16x16xf32> to vector<2x16x16xf32>
    %90 = vector.shape_cast %47 : vector<2x16x16xf32> to vector<2x1x16x16xf32>
    tpu.vector_store %arg3[%c0_20, %c1_21, %c0_22, %c0_23], %90 {strides = array<i32>} : memref<2x3x16x16xf32, #tpu.memory_space<vmem>>, vector<2x1x16x16xf32>,
    %c0_24 = arith.constant 0 : index
    %c2_25 = arith.constant 2 : index
    %c0_26 = arith.constant 0 : index
    %c0_27 = arith.constant 0 : index
    %91 = vector.load %arg3[%c0_24, %c2_25, %c0_26, %c0_27] : memref<2x3x16x16xf32, #tpu.memory_space<vmem>>, vector<2x1x16x16xf32>
    %92 = vector.shape_cast %91 : vector<2x1x16x16xf32> to vector<2x16x16xf32>
    %93 = vector.shape_cast %84 : vector<2x16x16xf32> to vector<2x1x16x16xf32>
    tpu.vector_store %arg3[%c0_24, %c2_25, %c0_26, %c0_27], %93 {strides = array<i32>} : memref<2x3x16x16xf32, #tpu.memory_space<vmem>>, vector<2x1x16x16xf32>,
    return
  }
  func.func @transform_0(%arg0: i32, %arg1: memref<10xf32, #tpu.memory_space<smem>>) -> (i32, i32, i32) {
    %c0_i32 = arith.constant 0 : i32
    %c0_i32_0 = arith.constant 0 : i32
    %c0_i32_1 = arith.constant 0 : i32
    return %arg0, %c0_i32, %c0_i32_0 : i32, i32, i32
  }
  func.func @transform_1(%arg0: i32, %arg1: memref<10xf32, #tpu.memory_space<smem>>) -> (i32, i32, i32, i32) {
    %c0_i32 = arith.constant 0 : i32
    %c0_i32_0 = arith.constant 0 : i32
    %c0_i32_1 = arith.constant 0 : i32
    %c0_i32_2 = arith.constant 0 : i32
    return %arg0, %c0_i32, %c0_i32_0, %c0_i32_1 : i32, i32, i32, i32
  }
}

</mosaic_0001>

<bundles_post_ra>
// kernel: tpu_custom_call.1
= control target key start
LH: loop header
LB: loop body
LE: loop exit
PB: predicated region body
PF: predicated region fallthrough
CT: control target
= control target key end

     0   :  { %s1043_s12 = smov [#allocation3]   ;;  %s1331_s0 = inlined_call_operand.hbm [shape: f32[10], index: 0, kind: input, shape index: {}]   ;;  %s1332_s1 = inlined_call_operand.hbm [shape: f32[2,16,16], index: 1, kind: input, shape index: {}]   ;;  %s1333_s2 = inlined_call_operand.hbm [shape: f32[2,3,16,16], index: 2, kind: output, shape index: {}]  }
   0x1   :  { %s8_s11 = sshll.u32 %s1331_s0, 4  ;;  %s9_s11 = int_to_ptr.hbm [resolvable:$true] %s8_s11 }
   0x2   :  { %11 = dma.hbm_to_smem %s9_s11, 16, %s1043_s12, [#allocation2] }
   0x3   :  { %1037 = dma.done.wait [#allocation2], 16 }
   0x4   :  { %1038 = vsyncadd [#allocation2], 4294967280 }
   0x5   :  { %14 = sfence }
   0x6   :  { %15 = vsyncpa [#allocation5], 0 }
   0x7   :  { %16 = vsyncpa [#allocation6], 0  ;;  %s21_s15 = sshll.u32 %s1332_s1, 4  ;;  %s1044_s16 = smov [#allocation4]   ;;  %s22_s15 = int_to_ptr.hbm [resolvable:$true] %s21_s15 }
   0x8   :  { %s23_s17 = sshll.u32 %s1044_s16, 4  ;;  %s1045_s18 = smov 128   ;;  %s24_s17 = int_to_ptr.vmem [resolvable:$true] %s23_s17 }
   0x9   :  { %s1046_s19 = smov 8  }
   0xa   :  { %29 = dma.hbm_to_vmem [thread:$0]  %s22_s15, 512, %s24_s17, [#allocation5], %s1045_s18, %s1045_s18, %s1046_s19  }
   0xb   :  { %1039 = dma.done.wait [#allocation5], 512  }
   0xc   :  { %1040 = vsyncadd [#allocation5], 4294966784  ;;  %v194_v0 = vlaneseq  ;;  %vm80_vm0 = vcmask 130048   ;;  %v1073_v3 = vld [vmem:[#allocation4 + $0x10] sm:$0xff]  ;;  %v1075_v4 = vld [vmem:[#allocation4] sm:$0xff]  ;;  %s888_s0 = sld [smem:[#allocation3 + $0x3]] }
   0xd   :  { %v1077_v5 = vld [vmem:[#allocation4 + $0x18] sm:$0xff]  ;;  %110 = vxpose.xlu1.b32.start [1/2] (short) (narrow) %v1073_v3, 16  ;;  %855 = vst.msk [vmem:[#allocation7 + $0x30] sm:$0xff] %vm80_vm0, %v1073_v3  ;;  %48 = vxpose.xlu0.b32.start [1/2] (short) (narrow) %v1075_v4, 16  ;;  %v1083_v6 = vld [vmem:[#allocation4 + $0x8] sm:$0xff]  ;;  %v171_v7 = vsel %vm80_vm0, %v1075_v4, 0.0 }
   0xe   :  { %v195_v1 = vshrl.u32 %v194_v0, 7  ;;  %v180_v8 = vsel %vm80_vm0, %v1073_v3, 0.0  ;;  %853 = vst.msk [vmem:[#allocation7] sm:$0xff] %vm80_vm0, %v1075_v4  ;;  %v172_v9 = vsel %vm80_vm0, %v1083_v6, 0.0  ;;  %v181_v10 = vsel %vm80_vm0, %v1077_v5, 0.0  ;;  %101 = vmatpush.msra.mxu0 %v1083_v6  ;;  %162 = vmatpush.msra.mxu1 %v1077_v5  ;;  %s887_s1 = sld [smem:[#allocation3 + $0x2]] }
   0xf   :  { %856 = vst.msk [vmem:[#allocation7 + $0x38] sm:$0xff] %vm80_vm0, %v1077_v5  ;;  %v173_v11 = vadd.f32 %v172_v9, %v171_v7  ;;  %v182_v12 = vadd.f32 %v181_v10, %v180_v8  ;;  %s889_s20 = sld [smem:[#allocation3 + $0x4]]  ;;  %v1130_v52 = vand.u32 127, %v194_v0  ;;  %vm576_vm1 = vcmask 130112   ;;  %s1047_s28 = smov [#allocation7]  }
  0x10   :  { %v202_v2 = vadd.s32 8, %v195_v1  ;;  %854 = vst.msk [vmem:[#allocation7 + $0x8] sm:$0xff] %vm80_vm0, %v1083_v6  ;;  %163 = vmatpush.msra.mxu1 %v1073_v3  ;;  %102 = vmatpush.msra.mxu0 %v1075_v4  ;;  %s890_s21 = sld [smem:[#allocation3 + $0x5]]  ;;  %s871_s29 = sshll.u32 %s1047_s28, 4  ;;  %s872_s29 = int_to_ptr.vmem [resolvable:$true] %s871_s29 }
  0x11   :  { %v174_v13 = vrot.slane %v173_v11, 4  ;;  %v183_v14 = vrot.slane %v182_v12, 4  ;;  %s893_s22 = sld [smem:[#allocation3 + $0x8]]  ;;  %v574_v62 = vadd.s32 4294967288, %v1130_v52  ;;  %s873_s4 = sshll.u32 %s1333_s2, 4  ;;  %s874_s4 = int_to_ptr.hbm [resolvable:$true] %s873_s4 }
  0x12   :  { %925 = vset.pattern.permute.xlu2 %v202_v2  ;;  %911 = vmatpush.xpose.msk.msrb.mxu1 %vm80_vm0, %v1077_v5  ;;  %v218_v36 = vstv %s888_s0  ;;  %s892_s23 = sld [smem:[#allocation3 + $0x7]] }
  0x13   :  { %907 = vmatpush.xpose.msk.msrb.mxu0 %vm80_vm0, %v1083_v6  ;;  %v175_v15 = vadd.f32 %v174_v13, %v173_v11  ;;  %v184_v16 = vadd.f32 %v183_v14, %v182_v12  ;;  %s891_s24 = sld [smem:[#allocation3 + $0x6]] }
  0x14   :  { %v189_v37 = vstv %s887_s1  ;;  %s894_s25 = sld [smem:[#allocation3 + $0x9]] }
  0x15   :  { %111 = vxpose.xlu1.b32.end [2/2] (short) (narrow) %v1077_v5, 16  ;;  %49 = vxpose.xlu0.b32.end [2/2] (short) (narrow) %v1083_v6, 16  ;;  %v176_v17 = vrot.slane %v175_v15, 2  ;;  %v185_v18 = vrot.slane %v184_v16, 2  ;;  %v227_v38 = vstv %s889_s20  ;;  %s38_s26 = sld [smem:[#allocation3]] }
  0x16   :  { %912 = vmatpush.xpose.msk.msrb.mxu1 %vm80_vm0, %v1073_v3  ;;  %v234_v49 = vstv %s890_s21  ;;  %s886_s27 = sld [smem:[#allocation3 + $0x1]] }
  0x17   :  { %908 = vmatpush.xpose.msk.msrb.mxu0 %vm80_vm0, %v1075_v4  ;;  %v177_v19 = vadd.f32 %v176_v17, %v175_v15  ;;  %v186_v21 = vadd.f32 %v185_v18, %v184_v16  ;;  %v562_v53 = vstv %s893_s22 }
  0x19   :  { %v178_v20 = vrot.slane %v177_v19, 1  ;;  %v187_v23 = vrot.slane %v186_v21, 1  ;;  %v548_v11 = vstv %s891_s24 }
  0x1b   :  { %v179_v22 = vadd.f32 %v178_v20, %v177_v19  ;;  %v188_v24 = vadd.f32 %v187_v23, %v186_v21  ;;  %v605_v21 = vstv %s894_s25 }
  0x1d   :  { %204 = vperm.xlu2 %925, %v179_v22   ;;  %v229_v45 = vmul.f32 %v227_v38, %v188_v24  ;;  %v228_v46 = vmul.f32 %v227_v38, %v179_v22 }
  0x25   :  { %216 = vperm.xlu2 %925, %v188_v24  }
  0x4e   :  { %540 = vadd.xlane.f32.xlu2 %v171_v7  ;;  %v553_v7 = vstv %s892_s23 }
  0x56   :  { %542 = vadd.xlane.f32.xlu2 %v172_v9 }
  0x5e   :  { %544 = vadd.xlane.f32.xlu2 %v180_v8 }
  0x66   :  { %546 = vadd.xlane.f32.xlu2 %v181_v10 }
  0x68   :  { %927 = vset.pattern.permute.xlu1 %v195_v1 }
  0x70   :  { %210 = vperm.xlu1 %927, %v188_v24  }
  0x77   :  { %v205_v29 = vpop.permute.xlu2 %204 }
  0x7c   :  { %926 = vset.pattern.permute.xlu0 %v195_v1 }
  0x7f   :  { %v217_v30 = vpop.permute.xlu2 %216 }
  0x80   :  { %v222_v19 = vmul.f32 %v218_v36, %v217_v30 }
  0x84   :  { %198 = vperm.xlu0 %926, %v179_v22  }
  0x8c   :  { %928 = vset.pattern.permute.xlu0 %v202_v2  ;;  %v220_v2 = vmul.f32 %v218_v36, %v205_v29 }
  0xb1   :  { %v126_v25 = vpop.trf.xlu1  ;;  %v64_v26 = vpop.trf.xlu0 }
  0xb2   :  { %895 = vmatmul.msk.f32.vlgmr.msra.gmra.mxu0 %vm80_vm0, %v64_v26  ;;  %897 = vmatmul.msk.f32.vlgmr.msra.gmra.mxu1 %vm80_vm0, %v126_v25 }
  0xb9   :  { %v127_v27 = vpop.trf.xlu1  ;;  %v65_v28 = vpop.trf.xlu0 }
  0xba   :  { %896 = vmatmul.msk.f32.gmra.mxu0 %vm80_vm0, %v65_v28  ;;  %898 = vmatmul.msk.f32.gmra.mxu1 %vm80_vm0, %v127_v27 }
  0xc1   :  { %v1125_v31 = vpop.xlane.xlu2 %540 }
  0xc2   :  { %913 = vmatmul.msk.f32.vlgmr.msrb.gmra.mxu1 %vm80_vm0, %v1073_v3  ;;  %909 = vmatmul.msk.f32.vlgmr.msrb.gmra.mxu0 %vm80_vm0, %v1075_v4 }
  0xc9   :  { %v1127_v32 = vpop.xlane.xlu2 %542 }
  0xca   :  { %914 = vmatmul.msk.f32.gmra.mxu1 %vm80_vm0, %v1077_v5  ;;  %910 = vmatmul.msk.f32.gmra.mxu0 %vm80_vm0, %v1083_v6 }
  0xd1   :  { %v545_v35 = vpop.xlane.xlu2 %544 }
  0xd2   :  { %v565_v63 = vmul.f32 %v562_v53, %v545_v35  ;;  %v556_v12 = vmul.f32 %v553_v7, %v545_v35 }
  0xd4   :  { %v578_v9 = vperm.slane %v565_v63, %v1130_v52 }
  0xd9   :  { %v547_v55 = vpop.xlane.xlu2 %546 }
  0xda   :  { %v566_v0 = vmul.f32 %v562_v53, %v547_v55  ;;  %v557_v25 = vmul.f32 %v553_v7, %v547_v55 }
  0xdc   :  { %v579_v10 = vperm.slane %v566_v0, %v574_v62 }
  0xde   :  { %v580_v18 = vsel %vm576_vm1, %v579_v10, %v578_v9 }
  0xe2   :  { %v211_v33 = vpop.permute.xlu1 %210 }
  0xe3   :  { %v221_v39 = vmul.f32 %v218_v36, %v211_v33 }
  0xf6   :  { %v199_v34 = vpop.permute.xlu0 %198 }
  0xf7   :  { %v219_v40 = vmul.f32 %v218_v36, %v199_v34 }
 0x12f   :  { %v104_v41 = vpop.f32.mrf.mxu0  ;;  %v165_v42 = vpop.f32.mrf.mxu1 }
 0x130   :  { %v190_v43 = vmul.f32 %v189_v37, %v104_v41  ;;  %v192_v44 = vmul.f32 %v189_v37, %v165_v42  ;;  %v564_v41 = vmul.f32 %v562_v53, %v1127_v32 }
 0x132   :  { %v225_v47 = vadd.f32 %v221_v39, %v192_v44  ;;  %v223_v48 = vadd.f32 %v219_v40, %v190_v43  ;;  %v563_v40 = vmul.f32 %v562_v53, %v1125_v31  ;;  %v554_v44 = vmul.f32 %v553_v7, %v1125_v31 }
 0x134   :  { %v232_v50 = vadd.f32 %v229_v45, %v225_v47  ;;  %v230_v51 = vadd.f32 %v228_v46, %v223_v48  ;;  %v573_v47 = vperm.slane %v563_v40, %v1130_v52  ;;  %v575_v48 = vperm.slane %v564_v41, %v574_v62 }
 0x135   :  { %v555_v52 = vmul.f32 %v553_v7, %v1127_v32 }
 0x136   :  { %v1132_v54 = vadd.f32 %v234_v49, %v232_v50  ;;  %v1134_v56 = vadd.f32 %v234_v49, %v230_v51  ;;  %v577_v50 = vsel %vm576_vm1, %v575_v48, %v573_v47 }
 0x137   :  { %v168_v57 = vpop.f32.mrf.mxu1  ;;  %v107_v58 = vpop.f32.mrf.mxu0 }
 0x138   :  { %v191_v59 = vmul.f32 %v189_v37, %v107_v58  ;;  %v257_v60 = vsel %vm80_vm0, %v1132_v54, inf  ;;  %v245_v61 = vsel %vm80_vm0, %v1132_v54, -inf  ;;  %v239_v1 = vsel %vm80_vm0, %v1134_v56, -inf }
 0x139   :  { %258 = vmin.xlane.f32.xlu0 %v257_v60  ;;  %246 = vmax.xlane.f32.xlu2 %v245_v61  ;;  %v251_v13 = vsel %vm80_vm0, %v1134_v56, inf  ;;  %v193_v15 = vmul.f32 %v189_v37, %v168_v57 }
 0x13a   :  { %240 = vmax.xlane.f32.xlu1 %v239_v1  ;;  %v224_v8 = vadd.f32 %v220_v2, %v191_v59 }
 0x13b   :  { %v226_v22 = vadd.f32 %v222_v19, %v193_v15 }
 0x13c   :  { %v231_v16 = vadd.f32 %v228_v46, %v224_v8 }
 0x13d   :  { %v233_v28 = vadd.f32 %v229_v45, %v226_v22 }
 0x13e   :  { %v1147_v24 = vadd.f32 %v234_v49, %v231_v16 }
 0x13f   :  { %v534_v14 = vpop.f32.mrf.mxu1  ;;  %v1155_v36 = vadd.f32 %v234_v49, %v233_v28  ;;  %v511_v43 = vpop.f32.mrf.mxu0 }
 0x140   :  { %v551_v17 = vmul.f32 %v548_v11, %v534_v14  ;;  %v242_v34 = vsel %vm80_vm0, %v1147_v24, -inf  ;;  %v549_v45 = vmul.f32 %v548_v11, %v511_v43  ;;  %v254_v46 = vsel %vm80_vm0, %v1147_v24, inf }
 0x141   :  { %252 = vmin.xlane.f32.xlu2 %v251_v13  ;;  %v248_v39 = vsel %vm80_vm0, %v1155_v36, -inf  ;;  %v260_v53 = vsel %vm80_vm0, %v1155_v36, inf }
 0x142   :  { %v560_v20 = vadd.f32 %v556_v12, %v551_v17  ;;  %v558_v49 = vadd.f32 %v554_v44, %v549_v45 }
 0x144   :  { %v603_v23 = vadd.f32 %v580_v18, %v560_v20  ;;  %v601_v51 = vadd.f32 %v577_v50, %v558_v49 }
 0x146   :  { %v1149_v26 = vadd.f32 %v605_v21, %v603_v23  ;;  %v1174_v55 = vadd.f32 %v605_v21, %v601_v51 }
 0x147   :  { %v537_v27 = vpop.f32.mrf.mxu1  ;;  %v514_v57 = vpop.f32.mrf.mxu0 }
 0x148   :  { %v552_v29 = vmul.f32 %v548_v11, %v537_v27  ;;  %v628_v33 = vsel %vm80_vm0, %v1149_v26, inf  ;;  %v610_v31 = vsel %vm80_vm0, %v1174_v55, -inf  ;;  %v550_v58 = vmul.f32 %v548_v11, %v514_v57 }
 0x149   :  { %629 = vmin.xlane.f32.xlu1 %v628_v33  ;;  %243 = vmax.xlane.f32.xlu2 %v242_v34  ;;  %v616_v59 = vsel %vm80_vm0, %v1149_v26, -inf  ;;  %v622_v62 = vsel %vm80_vm0, %v1174_v55, inf }
 0x14a   :  { %v561_v30 = vadd.f32 %v557_v25, %v552_v29  ;;  %v559_v60 = vadd.f32 %v555_v52, %v550_v58 }
 0x14c   :  { %v604_v35 = vadd.f32 %v580_v18, %v561_v30  ;;  %v602_v61 = vadd.f32 %v577_v50, %v559_v60 }
 0x14e   :  { %v1157_v37 = vadd.f32 %v605_v21, %v604_v35  ;;  %v1183_v63 = vadd.f32 %v605_v21, %v602_v61 }
 0x150   :  { %v619_v38 = vsel %vm80_vm0, %v1157_v37, -inf  ;;  %v631_v42 = vsel %vm80_vm0, %v1157_v37, inf  ;;  %v613_v0 = vsel %vm80_vm0, %v1183_v63, -inf  ;;  %v625_v32 = vsel %vm80_vm0, %v1183_v63, inf }
 0x151   :  { %620 = vmax.xlane.f32.xlu1 %v619_v38  ;;  %249 = vmax.xlane.f32.xlu2 %v248_v39 }
 0x159   :  { %632 = vmin.xlane.f32.xlu1 %v631_v42  ;;  %255 = vmin.xlane.f32.xlu2 %v254_v46 }
 0x161   :  { %261 = vmin.xlane.f32.xlu2 %v260_v53 }
 0x169   :  { %611 = vmax.xlane.f32.xlu2 %v610_v31 }
 0x171   :  { %617 = vmax.xlane.f32.xlu2 %v616_v59 }
 0x179   :  { %623 = vmin.xlane.f32.xlu2 %v622_v62 }
 0x181   :  { %614 = vmax.xlane.f32.xlu2 %v613_v0 }
 0x189   :  { %626 = vmin.xlane.f32.xlu2 %v625_v32 }
 0x1ac   :  { %v247_v1 = vpop.xlane.xlu2 %246  ;;  %v1189_v10 = vpop.xlane.xlu0 %258 }
 0x1ad   :  { %v241_v2 = vpop.xlane.xlu1 %240  ;;  %v269_v12 = vsub.f32 %v247_v1, %v1189_v10 }
 0x1af   :  { %v273_v15 = vadd.f32 1e-08, %v269_v12 }
 0x1b1   :  { %vm310_vm7 = vweird.f32 %v273_v15  ;;  %v316_v53 = vand.u32 2147483648, %v273_v15  ;;  %v314_v52 = vand.u32 2147483647, %v273_v15 }
 0x1b3   :  { %vm315_vm12 = vcmp.eq.f32.partialorder %v314_v52, 8.507059e+37 }
 0x1b4   :  { %v253_v7 = vpop.xlane.xlu2 %252 }
 0x1b5   :  { %v267_v8 = vsub.f32 %v241_v2, %v253_v7  ;;  %v263_v25 = vsub.f32 %v1134_v56, %v253_v7  ;;  %v317_v7 = vor.u32 1.1754944e-38, %v316_v53 }
 0x1b7   :  { %v271_v9 = vadd.f32 1e-08, %v267_v8 }
 0x1b9   :  { %929 = vrcp.f32 %v271_v9  ;;  %v286_v17 = vand.u32 2147483648, %v271_v9  ;;  %v284_v20 = vand.u32 2147483647, %v271_v9  ;;  %vm280_vm3 = vweird.f32 %v271_v9 }
 0x1ba   :  { %931 = vrcp.f32 %v273_v15 }
 0x1bb   :  { %v287_v23 = vor.u32 1.1754944e-38, %v286_v17  ;;  %vm285_vm5 = vcmp.eq.f32.partialorder %v284_v20, 8.507059e+37 }
 0x1bc   :  { %v244_v11 = vpop.xlane.xlu2 %243  ;;  %v1192_v21 = vpop.xlane.xlu1 %629 }
 0x1bd   :  { %v636_v61 = vsub.f32 %v1149_v26, %v1192_v21 }
 0x1bf   :  { %v930_v13 = vpop.eup %929 }
 0x1c0   :  { %v276_v14 = vmul.f32 %v930_v13, %v271_v9  ;;  %vm281_vm2 = vweird.f32 %v930_v13  ;;  %v932_v33 = vpop.eup %931 }
 0x1c1   :  { %vm282_vm4 = vmor %vm280_vm3, %vm281_vm2  ;;  %v306_v38 = vmul.f32 %v932_v33, %v273_v15  ;;  %vm311_vm6 = vweird.f32 %v932_v33  ;;  %v265_v15 = vsub.f32 %v1132_v54, %v1189_v10 }
 0x1c2   :  { %v277_v16 = vsub.f32 1.0, %v276_v14  ;;  %vm1205_vm9 = vmor %vm310_vm7, %vm311_vm6 }
 0x1c3   :  { %v307_v41 = vsub.f32 1.0, %v306_v38 }
 0x1c4   :  { %v278_v18 = vmul.f32 %v930_v13, %v277_v16  ;;  %v250_v19 = vpop.xlane.xlu2 %249  ;;  %v621_v40 = vpop.xlane.xlu1 %620 }
 0x1c5   :  { %v308_v45 = vmul.f32 %v932_v33, %v307_v41 }
 0x1c6   :  { %v279_v22 = vadd.f32 %v930_v13, %v278_v18 }
 0x1c7   :  { %v309_v51 = vadd.f32 %v932_v33, %v308_v45 }
 0x1c8   :  { %v283_v27 = vsel %vm282_vm4, %v930_v13, %v279_v22 }
 0x1c9   :  { %v288_v28 = vsel %vm285_vm5, %v287_v23, %v283_v27  ;;  %v313_v32 = vsel %vm1205_vm9, %v932_v33, %v309_v51 }
 0x1ca   :  { %v289_v29 = vmul.f32 %v288_v28, %v263_v25  ;;  %v318_v14 = vsel %vm315_vm12, %v317_v7, %v313_v32 }
 0x1cc   :  { %v256_v34 = vpop.xlane.xlu2 %255  ;;  %v335_v30 = vmul.f32 1.442695, %v289_v29  ;;  %v1202_v49 = vpop.xlane.xlu1 %632 }
 0x1cd   :  { %v268_v35 = vsub.f32 %v244_v11, %v256_v34  ;;  %v641_v58 = vsub.f32 %v621_v40, %v1202_v49  ;;  %v264_v9 = vsub.f32 %v1147_v24, %v256_v34  ;;  %v319_v24 = vmul.f32 %v318_v14, %v265_v15 }
 0x1ce   :  { %933 = vpow2.f32 %v335_v30 }
 0x1cf   :  { %v272_v39 = vadd.f32 1e-08, %v268_v35  ;;  %v1211_v8 = vadd.f32 1e-08, %v641_v58  ;;  %v339_v33 = vmul.f32 1.442695, %v319_v24 }
 0x1d1   :  { %935 = vrcp.f32 %v272_v39  ;;  %v301_v31 = vand.u32 2147483648, %v272_v39  ;;  %v299_v60 = vand.u32 2147483647, %v272_v39  ;;  %vm295_vm10 = vweird.f32 %v272_v39 }
 0x1d2   :  { %vm696_vm5 = vweird.f32 %v1211_v8 }
 0x1d3   :  { %v302_v1 = vor.u32 1.1754944e-38, %v301_v31  ;;  %vm300_vm13 = vcmp.eq.f32.partialorder %v299_v60, 8.507059e+37 }
 0x1d4   :  { %v1195_v42 = vpop.eup %933  ;;  %v1197_v43 = vpop.xlane.xlu2 %261 }
 0x1d5   :  { %v270_v56 = vsub.f32 %v250_v19, %v1197_v43  ;;  %v343_v44 = vsel %vm80_vm0, %v1195_v42, 0.0  ;;  %v266_v54 = vsub.f32 %v1155_v36, %v1197_v43 }
 0x1d6   :  { %344 = vadd.xlane.f32.xlu1 %v343_v44 }
 0x1d7   :  { %v274_v46 = vadd.f32 1e-08, %v270_v56  ;;  %v936_v47 = vpop.eup %935 }
 0x1d8   :  { %v291_v48 = vmul.f32 %v936_v47, %v272_v39  ;;  %vm296_vm8 = vweird.f32 %v936_v47 }
 0x1d9   :  { %937 = vrcp.f32 %v274_v46  ;;  %vm297_vm11 = vmor %vm295_vm10, %vm296_vm8  ;;  %v331_v17 = vand.u32 2147483648, %v274_v46  ;;  %v329_v19 = vand.u32 2147483647, %v274_v46  ;;  %vm325_vm15 = vweird.f32 %v274_v46 }
 0x1da   :  { %v292_v50 = vsub.f32 1.0, %v291_v48  ;;  %939 = vrcp.f32 %v1211_v8 }
 0x1db   :  { %v332_v27 = vor.u32 1.1754944e-38, %v331_v17  ;;  %vm330_vm2 = vcmp.eq.f32.partialorder %v329_v19, 8.507059e+37 }
 0x1dc   :  { %v612_v57 = vpop.xlane.xlu2 %611  ;;  %v293_v59 = vmul.f32 %v936_v47, %v292_v50 }
 0x1de   :  { %v294_v0 = vadd.f32 %v936_v47, %v293_v59 }
 0x1df   :  { %v938_v62 = vpop.eup %937 }
 0x1e0   :  { %v321_v2 = vmul.f32 %v938_v62, %v274_v46  ;;  %v298_v11 = vsel %vm297_vm11, %v936_v47, %v294_v0  ;;  %vm326_vm14 = vweird.f32 %v938_v62  ;;  %v1220_v30 = vpop.eup %939 }
 0x1e1   :  { %v303_v12 = vsel %vm300_vm13, %v302_v1, %v298_v11  ;;  %vm327_vm1 = vmor %vm325_vm15, %vm326_vm14  ;;  %v692_v41 = vmul.f32 %v1220_v30, %v1211_v8  ;;  %vm697_vm7 = vweird.f32 %v1220_v30  ;;  %v700_v1 = vand.u32 2147483647, %v1211_v8 }
 0x1e2   :  { %v322_v13 = vsub.f32 1.0, %v321_v2  ;;  %v304_v16 = vmul.f32 %v303_v12, %v264_v9  ;;  %v702_v2 = vand.u32 2147483648, %v1211_v8  ;;  %vm1247_vm9 = vmor %vm696_vm5, %vm697_vm7 }
 0x1e3   :  { %v693_v45 = vsub.f32 1.0, %v692_v41  ;;  %vm701_vm11 = vcmp.eq.f32.partialorder %v700_v1, 8.507059e+37 }
 0x1e4   :  { %v323_v18 = vmul.f32 %v938_v62, %v322_v13  ;;  %v618_v20 = vpop.xlane.xlu2 %617  ;;  %v337_v22 = vmul.f32 1.442695, %v304_v16  ;;  %v703_v17 = vor.u32 1.1754944e-38, %v702_v2 }
 0x1e5   :  { %v640_v23 = vsub.f32 %v618_v20, %v1192_v21  ;;  %v694_v52 = vmul.f32 %v1220_v30, %v693_v45 }
 0x1e6   :  { %v324_v25 = vadd.f32 %v938_v62, %v323_v18  ;;  %941 = vpow2.f32 %v337_v22 }
 0x1e7   :  { %v644_v28 = vadd.f32 1e-08, %v640_v23  ;;  %v695_v9 = vadd.f32 %v1220_v30, %v694_v52 }
 0x1e8   :  { %v328_v10 = vsel %vm327_vm1, %v938_v62, %v324_v25 }
 0x1e9   :  { %v333_v29 = vsel %vm330_vm2, %v332_v27, %v328_v10  ;;  %943 = vrcp.f32 %v644_v28  ;;  %v687_v48 = vand.u32 2147483648, %v644_v28  ;;  %v685_v31 = vand.u32 2147483647, %v644_v28 }
 0x1ea   :  { %v334_v34 = vmul.f32 %v333_v29, %v266_v54  ;;  %945 = vpow2.f32 %v339_v33  ;;  %vm681_vm4 = vweird.f32 %v644_v28  ;;  %v699_v8 = vsel %vm1247_vm9, %v1220_v30, %v695_v9 }
 0x1eb   :  { %v688_v62 = vor.u32 1.1754944e-38, %v687_v48  ;;  %vm686_vm8 = vcmp.eq.f32.partialorder %v685_v31, 8.507059e+37  ;;  %v704_v25 = vsel %vm701_vm11, %v703_v17, %v699_v8 }
 0x1ec   :  { %v341_v35 = vmul.f32 1.442695, %v334_v34  ;;  %v1222_v38 = vpop.xlane.xlu2 %623  ;;  %v1224_v39 = vpop.eup %941 }
 0x1ed   :  { %v638_v40 = vsub.f32 %v612_v57, %v1222_v38  ;;  %v346_v36 = vsel %vm80_vm0, %v1224_v39, 0.0  ;;  %v634_v23 = vsub.f32 %v1174_v55, %v1222_v38 }
 0x1ee   :  { %947 = vpow2.f32 %v341_v35  ;;  %347 = vadd.xlane.f32.xlu0 %v346_v36 }
 0x1ef   :  { %v944_v43 = vpop.eup %943  ;;  %v642_v56 = vadd.f32 1e-08, %v638_v40 }
 0x1f0   :  { %v677_v44 = vmul.f32 %v944_v43, %v644_v28  ;;  %v1231_v47 = vpop.eup %945  ;;  %vm682_vm3 = vweird.f32 %v944_v43  ;;  %v637_v28 = vsub.f32 %v1157_v37, %v1202_v49 }
 0x1f1   :  { %949 = vrcp.f32 %v642_v56  ;;  %v349_v58 = vsel %vm80_vm0, %v1231_v47, 0.0  ;;  %vm683_vm6 = vmor %vm681_vm4, %vm682_vm3  ;;  %v657_v21 = vand.u32 2147483648, %v642_v56  ;;  %v655_v14 = vand.u32 2147483647, %v642_v56 }
 0x1f2   :  { %v678_v46 = vsub.f32 1.0, %v677_v44  ;;  %vm651_vm12 = vweird.f32 %v642_v56  ;;  %v705_v29 = vmul.f32 %v704_v25, %v637_v28 }
 0x1f3   :  { %v658_v20 = vor.u32 1.1754944e-38, %v657_v21  ;;  %vm656_vm14 = vcmp.eq.f32.partialorder %v655_v14, 8.507059e+37 }
 0x1f4   :  { %v1233_v50 = vpop.eup %947  ;;  %v679_v51 = vmul.f32 %v944_v43, %v678_v46  ;;  %v615_v53 = vpop.xlane.xlu2 %614  ;;  %v712_v55 = vmul.f32 1.442695, %v705_v29 }
 0x1f5   :  { %v352_v57 = vsel %vm80_vm0, %v1233_v50, 0.0 }
 0x1f6   :  { %353 = vadd.xlane.f32.xlu2 %v352_v57  ;;  %v680_v59 = vadd.f32 %v944_v43, %v679_v51  ;;  %350 = vadd.xlane.f32.xlu0 %v349_v58 }
 0x1f7   :  { %v950_v60 = vpop.eup %949 }
 0x1f8   :  { %v647_v0 = vmul.f32 %v950_v60, %v642_v56  ;;  %v684_v32 = vsel %vm683_vm6, %v944_v43, %v680_v59  ;;  %vm652_vm10 = vweird.f32 %v950_v60 }
 0x1f9   :  { %v689_v7 = vsel %vm686_vm8, %v688_v62, %v684_v32  ;;  %vm653_vm13 = vmor %vm651_vm12, %vm652_vm10 }
 0x1fa   :  { %v648_v11 = vsub.f32 1.0, %v647_v0  ;;  %v690_v12 = vmul.f32 %v689_v7, %v636_v61 }
 0x1fc   :  { %v649_v13 = vmul.f32 %v950_v60, %v648_v11  ;;  %v627_v15 = vpop.xlane.xlu2 %626  ;;  %v710_v16 = vmul.f32 1.442695, %v690_v12 }
 0x1fd   :  { %v639_v18 = vsub.f32 %v615_v53, %v627_v15  ;;  %v635_v44 = vsub.f32 %v1183_v63, %v627_v15 }
 0x1fe   :  { %v650_v19 = vadd.f32 %v950_v60, %v649_v13  ;;  %951 = vpow2.f32 %v710_v16 }
 0x1ff   :  { %v643_v22 = vadd.f32 1e-08, %v639_v18 }
 0x200   :  { %v654_v24 = vsel %vm653_vm13, %v950_v60, %v650_v19 }
 0x201   :  { %v659_v27 = vsel %vm656_vm14, %v658_v20, %v654_v24  ;;  %953 = vrcp.f32 %v643_v22  ;;  %v672_v40 = vand.u32 2147483648, %v643_v22  ;;  %v670_v37 = vand.u32 2147483647, %v643_v22 }
 0x202   :  { %v660_v54 = vmul.f32 %v659_v27, %v634_v23  ;;  %vm666_vm1 = vweird.f32 %v643_v22 }
 0x203   :  { %v673_v56 = vor.u32 1.1754944e-38, %v672_v40  ;;  %vm671_vm3 = vcmp.eq.f32.partialorder %v670_v37, 8.507059e+37 }
 0x204   :  { %v1258_v10 = vpop.eup %951  ;;  %v706_v33 = vmul.f32 1.442695, %v660_v54 }
 0x205   :  { %v720_v34 = vsel %vm80_vm0, %v1258_v10, 0.0 }
 0x206   :  { %955 = vpow2.f32 %v706_v33  ;;  %721 = vadd.xlane.f32.xlu1 %v720_v34 }
 0x207   :  { %v954_v30 = vpop.eup %953  ;;  %957 = vpow2.f32 %v712_v55 }
 0x208   :  { %v662_v35 = vmul.f32 %v954_v30, %v643_v22  ;;  %vm667_vm15 = vweird.f32 %v954_v30 }
 0x209   :  { %vm668_vm2 = vmor %vm666_vm1, %vm667_vm15 }
 0x20a   :  { %v663_v38 = vsub.f32 1.0, %v662_v35 }
 0x20c   :  { %v1262_v41 = vpop.eup %955  ;;  %v664_v36 = vmul.f32 %v954_v30, %v663_v38 }
 0x20d   :  { %v714_v49 = vsel %vm80_vm0, %v1262_v41, 0.0  ;;  %v1267_v48 = vpop.eup %957 }
 0x20e   :  { %v665_v43 = vadd.f32 %v954_v30, %v664_v36  ;;  %715 = vadd.xlane.f32.xlu2 %v714_v49  ;;  %v723_v31 = vsel %vm80_vm0, %v1267_v48, 0.0 }
 0x210   :  { %v669_v45 = vsel %vm668_vm2, %v954_v30, %v665_v43 }
 0x211   :  { %v674_v46 = vsel %vm671_vm3, %v673_v56, %v669_v45 }
 0x212   :  { %v675_v51 = vmul.f32 %v674_v46, %v635_v44 }
 0x214   :  { %v708_v53 = vmul.f32 1.442695, %v675_v51 }
 0x216   :  { %959 = vpow2.f32 %v708_v53  ;;  %724 = vadd.xlane.f32.xlu2 %v723_v31 }
 0x21c   :  { %v1271_v57 = vpop.eup %959 }
 0x21d   :  { %v717_v52 = vsel %vm80_vm0, %v1271_v57, 0.0 }
 0x21e   :  { %718 = vadd.xlane.f32.xlu0 %v717_v52 }
 0x249   :  { %v345_v58 = vpop.xlane.xlu1 %344 }
 0x24a   :  { %961 = vrcp.f32 %v345_v58  ;;  %vm360_vm6 = vweird.f32 %v345_v58  ;;  %v366_v21 = vand.u32 2147483648, %v345_v58  ;;  %v364_v16 = vand.u32 2147483647, %v345_v58 }
 0x24c   :  { %v367_v23 = vor.u32 1.1754944e-38, %v366_v21  ;;  %vm365_vm11 = vcmp.eq.f32.partialorder %v364_v16, 8.507059e+37 }
 0x250   :  { %v962_v63 = vpop.eup %961 }
 0x251   :  { %v356_v59 = vmul.f32 %v962_v63, %v345_v58  ;;  %vm361_vm4 = vweird.f32 %v962_v63 }
 0x252   :  { %vm1275_vm8 = vmor %vm360_vm6, %vm361_vm4 }
 0x253   :  { %v357_v61 = vsub.f32 1.0, %v356_v59 }
 0x255   :  { %v358_v32 = vmul.f32 %v962_v63, %v357_v61 }
 0x257   :  { %v359_v26 = vadd.f32 %v962_v63, %v358_v32 }
 0x259   :  { %v363_v22 = vsel %vm1275_vm8, %v962_v63, %v359_v26 }
 0x25a   :  { %v368_v29 = vsel %vm365_vm11, %v367_v23, %v363_v22 }
 0x25b   :  { %v411_v38 = vmul.f32 %v1195_v42, %v368_v29 }
 0x261   :  { %v348_v60 = vpop.xlane.xlu0 %347 }
 0x262   :  { %963 = vrcp.f32 %v348_v60  ;;  %v380_v9 = vand.u32 2147483648, %v348_v60  ;;  %v378_v12 = vand.u32 2147483647, %v348_v60  ;;  %vm374_vm7 = vweird.f32 %v348_v60 }
 0x264   :  { %v381_v8 = vor.u32 1.1754944e-38, %v380_v9  ;;  %vm379_vm10 = vcmp.eq.f32.partialorder %v378_v12, 8.507059e+37 }
 0x268   :  { %v964_v62 = vpop.eup %963 }
 0x269   :  { %v354_v0 = vpop.xlane.xlu2 %353  ;;  %v370_v1 = vmul.f32 %v964_v62, %v348_v60  ;;  %v351_v2 = vpop.xlane.xlu0 %350  ;;  %vm375_vm5 = vweird.f32 %v964_v62 }
 0x26a   :  { %965 = vrcp.f32 %v354_v0  ;;  %vm376_vm9 = vmor %vm374_vm7, %vm375_vm5  ;;  %v408_v33 = vand.u32 2147483648, %v354_v0  ;;  %v406_v30 = vand.u32 2147483647, %v354_v0  ;;  %v394_v55 = vand.u32 2147483648, %v351_v2 }
 0x26b   :  { %967 = vrcp.f32 %v351_v2  ;;  %v371_v7 = vsub.f32 1.0, %v370_v1  ;;  %vm402_vm13 = vweird.f32 %v354_v0  ;;  %v392_v36 = vand.u32 2147483647, %v351_v2 }
 0x26c   :  { %vm388_vm1 = vweird.f32 %v351_v2  ;;  %v409_v49 = vor.u32 1.1754944e-38, %v408_v33  ;;  %vm407_vm2 = vcmp.eq.f32.partialorder %v406_v30, 8.507059e+37  ;;  %v395_v43 = vor.u32 1.1754944e-38, %v394_v55 }
 0x26d   :  { %v372_v11 = vmul.f32 %v964_v62, %v371_v7  ;;  %vm393_vm4 = vcmp.eq.f32.partialorder %v392_v36, 8.507059e+37 }
 0x26f   :  { %v373_v14 = vadd.f32 %v964_v62, %v372_v11 }
 0x270   :  { %v966_v13 = vpop.eup %965 }
 0x271   :  { %v968_v17 = vpop.eup %967  ;;  %v398_v18 = vmul.f32 %v966_v13, %v354_v0  ;;  %v377_v20 = vsel %vm376_vm9, %v964_v62, %v373_v14  ;;  %vm403_vm12 = vweird.f32 %v966_v13 }
 0x272   :  { %v384_v19 = vmul.f32 %v968_v17, %v351_v2  ;;  %v382_v25 = vsel %vm379_vm10, %v381_v8, %v377_v20  ;;  %vm389_vm14 = vweird.f32 %v968_v17  ;;  %vm404_vm15 = vmor %vm402_vm13, %vm403_vm12 }
 0x273   :  { %v399_v24 = vsub.f32 1.0, %v398_v18  ;;  %v412_v28 = vmul.f32 %v1224_v39, %v382_v25  ;;  %vm390_vm3 = vmor %vm388_vm1, %vm389_vm14 }
 0x274   :  { %v385_v27 = vsub.f32 1.0, %v384_v19 }
 0x275   :  { %v400_v54 = vmul.f32 %v966_v13, %v399_v24  ;;  %899 = vmatpush.xpose.msk.msra.mxu2 %vm80_vm0, %v412_v28 }
 0x276   :  { %v386_v34 = vmul.f32 %v968_v17, %v385_v27 }
 0x277   :  { %v401_v35 = vadd.f32 %v966_v13, %v400_v54 }
 0x278   :  { %v387_v40 = vadd.f32 %v968_v17, %v386_v34 }
 0x279   :  { %v722_v39 = vpop.xlane.xlu1 %721  ;;  %v405_v37 = vsel %vm404_vm15, %v966_v13, %v401_v35  ;;  %900 = vmatpush.xpose.msk.msra.mxu2 %vm80_vm0, %v411_v38 }
 0x27a   :  { %969 = vrcp.f32 %v722_v39  ;;  %v410_v56 = vsel %vm407_vm2, %v409_v49, %v405_v37  ;;  %v391_v44 = vsel %vm390_vm3, %v968_v17, %v387_v40  ;;  %v765_v60 = vand.u32 2147483648, %v722_v39 }
 0x27b   :  { %v414_v45 = vmul.f32 %v1233_v50, %v410_v56  ;;  %v396_v42 = vsel %vm393_vm4, %v395_v43, %v391_v44  ;;  %vm759_vm6 = vweird.f32 %v722_v39  ;;  %v763_v61 = vand.u32 2147483647, %v722_v39 }
 0x27c   :  { %901 = vmatmul.msk.f32.vlgmr.msra.gmra.mxu2 %vm80_vm0, %v1075_v4  ;;  %v413_v51 = vmul.f32 %v1231_v47, %v396_v42  ;;  %v766_v2 = vor.u32 1.1754944e-38, %v765_v60  ;;  %v485_v40 = vstv %s38_s26 }
 0x27d   :  { %806 = vmatpush.msrb.mxu2 %v1083_v6  ;;  %903 = vmatpush.xpose.msk.msra.mxu3 %vm80_vm0, %v414_v45  ;;  %vm764_vm9 = vcmp.eq.f32.partialorder %v763_v61, 8.507059e+37 }
 0x27f   :  { %807 = vmatpush.msrb.mxu2 %v1075_v4 }
 0x280   :  { %v970_v46 = vpop.eup %969 }
 0x281   :  { %v755_v53 = vmul.f32 %v970_v46, %v722_v39  ;;  %v716_v31 = vpop.xlane.xlu2 %715  ;;  %904 = vmatpush.xpose.msk.msra.mxu3 %vm80_vm0, %v413_v51  ;;  %vm760_vm5 = vweird.f32 %v970_v46  ;;  %v844_v51 = vstv %s886_s27 }
 0x282   :  { %971 = vrcp.f32 %v716_v31  ;;  %vm761_vm7 = vmor %vm759_vm6, %vm760_vm5  ;;  %v737_v1 = vand.u32 2147483648, %v716_v31  ;;  %v735_v7 = vand.u32 2147483647, %v716_v31  ;;  %vm731_vm10 = vweird.f32 %v716_v31 }
 0x283   :  { %v756_v52 = vsub.f32 1.0, %v755_v53 }
 0x284   :  { %905 = vmatmul.msk.f32.vlgmr.msra.gmra.mxu3 %vm80_vm0, %v1073_v3  ;;  %902 = vmatmul.msk.f32.gmra.mxu2 %vm80_vm0, %v1083_v6  ;;  %v738_v26 = vor.u32 1.1754944e-38, %v737_v1  ;;  %vm736_vm12 = vcmp.eq.f32.partialorder %v735_v7, 8.507059e+37 }
 0x285   :  { %835 = vmatpush.msrb.mxu3 %v1077_v5  ;;  %v757_v50 = vmul.f32 %v970_v46, %v756_v52 }
 0x287   :  { %836 = vmatpush.msrb.mxu3 %v1073_v3  ;;  %v758_v63 = vadd.f32 %v970_v46, %v757_v50 }
 0x288   :  { %v972_v58 = vpop.eup %971 }
 0x289   :  { %v727_v47 = vmul.f32 %v972_v58, %v716_v31  ;;  %v725_v59 = vpop.xlane.xlu2 %724  ;;  %v762_v0 = vsel %vm761_vm7, %v970_v46, %v758_v63  ;;  %vm732_vm8 = vweird.f32 %v972_v58 }
 0x28a   :  { %973 = vrcp.f32 %v725_v59  ;;  %vm733_vm11 = vmor %vm731_vm10, %vm732_vm8  ;;  %v767_v12 = vsel %vm764_vm9, %v766_v2, %v762_v0  ;;  %v779_v18 = vand.u32 2147483648, %v725_v59  ;;  %v777_v20 = vand.u32 2147483647, %v725_v59 }
 0x28b   :  { %v728_v62 = vsub.f32 1.0, %v727_v47  ;;  %v784_v16 = vmul.f32 %v1258_v10, %v767_v12  ;;  %vm773_vm14 = vweird.f32 %v725_v59 }
 0x28c   :  { %906 = vmatmul.msk.f32.gmra.mxu3 %vm80_vm0, %v1077_v5  ;;  %v780_v24 = vor.u32 1.1754944e-38, %v779_v18  ;;  %vm778_vm1 = vcmp.eq.f32.partialorder %v777_v20, 8.507059e+37 }
 0x28d   :  { %v729_v32 = vmul.f32 %v972_v58, %v728_v62 }
 0x28f   :  { %v730_v9 = vadd.f32 %v972_v58, %v729_v32 }
 0x290   :  { %v974_v11 = vpop.eup %973 }
 0x291   :  { %v769_v21 = vmul.f32 %v974_v11, %v725_v59  ;;  %v719_v13 = vpop.xlane.xlu0 %718  ;;  %v734_v14 = vsel %vm733_vm11, %v972_v58, %v730_v9  ;;  %vm774_vm13 = vweird.f32 %v974_v11 }
 0x292   :  { %975 = vrcp.f32 %v719_v13  ;;  %v739_v17 = vsel %vm736_vm12, %v738_v26, %v734_v14  ;;  %vm775_vm15 = vmor %vm773_vm14, %vm774_vm13  ;;  %v749_v33 = vand.u32 2147483647, %v719_v13  ;;  %vm745_vm3 = vweird.f32 %v719_v13 }
 0x293   :  { %v770_v15 = vsub.f32 1.0, %v769_v21  ;;  %v782_v8 = vmul.f32 %v1262_v41, %v739_v17  ;;  %v751_v41 = vand.u32 2147483648, %v719_v13 }
 0x294   :  { %917 = vmatmul.msk.f32.vlgmr.msrb.gmra.mxu3 %vm80_vm0, %v784_v16  ;;  %vm750_vm5 = vcmp.eq.f32.partialorder %v749_v33, 8.507059e+37 }
 0x295   :  { %v771_v19 = vmul.f32 %v974_v11, %v770_v15  ;;  %915 = vmatmul.msk.f32.vlgmr.msrb.gmra.mxu2 %vm80_vm0, %v782_v8  ;;  %v752_v30 = vor.u32 1.1754944e-38, %v751_v41 }
 0x297   :  { %v772_v22 = vadd.f32 %v974_v11, %v771_v19 }
 0x298   :  { %v976_v23 = vpop.eup %975 }
 0x299   :  { %v741_v25 = vmul.f32 %v976_v23, %v719_v13  ;;  %v776_v27 = vsel %vm775_vm15, %v974_v11, %v772_v22  ;;  %vm746_vm2 = vweird.f32 %v976_v23 }
 0x29a   :  { %v781_v10 = vsel %vm778_vm1, %v780_v24, %v776_v27  ;;  %vm747_vm4 = vmor %vm745_vm3, %vm746_vm2 }
 0x29b   :  { %v742_v28 = vsub.f32 1.0, %v741_v25  ;;  %v785_v54 = vmul.f32 %v1267_v48, %v781_v10 }
 0x29d   :  { %v743_v29 = vmul.f32 %v976_v23, %v742_v28  ;;  %918 = vmatmul.msk.f32.gmra.mxu3 %vm80_vm0, %v785_v54 }
 0x29f   :  { %v744_v34 = vadd.f32 %v976_v23, %v743_v29 }
 0x2a1   :  { %v748_v55 = vsel %vm747_vm4, %v976_v23, %v744_v34 }
 0x2a2   :  { %v753_v35 = vsel %vm750_vm5, %v752_v30, %v748_v55 }
 0x2a3   :  { %v783_v38 = vmul.f32 %v1271_v57, %v753_v35 }
 0x2a5   :  { %916 = vmatmul.msk.f32.gmra.mxu2 %vm80_vm0, %v783_v38 }
 0x2ff   :  { %v444_v48 = vpop.f32.mrf.mxu2 }
 0x300   :  { %v486_v36 = vmul.f32 %v485_v40, %v444_v48 }
 0x302   :  { %v490_v39 = vadd.f32 %v486_v36, %v1075_v4 }
 0x304   :  { %858 = vst.msk [vmem:[#allocation7 + $0x10] sm:$0xff] %vm80_vm0, %v490_v39 }
 0x307   :  { %v479_v37 = vpop.f32.mrf.mxu3  ;;  %v447_v49 = vpop.f32.mrf.mxu2 }
 0x308   :  { %v488_v43 = vmul.f32 %v485_v40, %v479_v37  ;;  %v487_v56 = vmul.f32 %v485_v40, %v447_v49 }
 0x30a   :  { %v492_v44 = vadd.f32 %v488_v43, %v1073_v3  ;;  %v491_v45 = vadd.f32 %v487_v56, %v1083_v6 }
 0x30c   :  { %860 = vst.msk [vmem:[#allocation7 + $0x40] sm:$0xff] %vm80_vm0, %v492_v44 }
 0x30d   :  { %859 = vst.msk [vmem:[#allocation7 + $0x18] sm:$0xff] %vm80_vm0, %v491_v45 }
 0x30f   :  { %v482_v57 = vpop.f32.mrf.mxu3 }
 0x310   :  { %v489_v42 = vmul.f32 %v485_v40, %v482_v57 }
 0x312   :  { %v493_v46 = vadd.f32 %v489_v42, %v1077_v5 }
 0x314   :  { %861 = vst.msk [vmem:[#allocation7 + $0x48] sm:$0xff] %vm80_vm0, %v493_v46 }
 0x317   :  { %v838_v53 = vpop.f32.mrf.mxu3 }
 0x318   :  { %v847_v31 = vmul.f32 %v844_v51, %v838_v53  ;;  %v809_v52 = vpop.f32.mrf.mxu2 }
 0x319   :  { %v845_v50 = vmul.f32 %v844_v51, %v809_v52 }
 0x31a   :  { %v851_v58 = vadd.f32 %v847_v31, %v1073_v3 }
 0x31b   :  { %v849_v63 = vadd.f32 %v845_v50, %v1075_v4 }
 0x31c   :  { %865 = vst.msk [vmem:[#allocation7 + $0x50] sm:$0xff] %vm80_vm0, %v851_v58 }
 0x31d   :  { %863 = vst.msk [vmem:[#allocation7 + $0x20] sm:$0xff] %vm80_vm0, %v849_v63 }
 0x320   :  { %v841_v47 = vpop.f32.mrf.mxu3 }
 0x321   :  { %v848_v59 = vmul.f32 %v844_v51, %v841_v47 }
 0x323   :  { %v852_v60 = vadd.f32 %v848_v59, %v1077_v5 }
 0x325   :  { %866 = vst.msk [vmem:[#allocation7 + $0x58] sm:$0xff] %vm80_vm0, %v852_v60 }
 0x328   :  { %v812_v61 = vpop.f32.mrf.mxu2 }
 0x329   :  { %v846_v3 = vmul.f32 %v844_v51, %v812_v61 }
 0x32b   :  { %v850_v4 = vadd.f32 %v846_v3, %v1083_v6 }
 0x32d   :  { %864 = vst.msk [vmem:[#allocation7 + $0x28] sm:$0xff] %vm80_vm0, %v850_v4 }
 0x32e   :  { %879 = dma.vmem_to_hbm [thread:$0]  %s872_s29, 1536, %s874_s4, [#allocation6], %s1045_s18, %s1045_s18, %s1046_s19  }
 0x32f   :  { %1041 = dma.done.wait [#allocation6], 1536  }
 0x330   :  { %1042 = vsyncadd [#allocation6], 4294965760 }
 0x331   :  { %884 = vsyncpa [#allocation5], 1 }
 0x332   :  { %885 = vsyncpa [#allocation6], 1 }

</bundles_post_ra>
